<compile_context>
chip_gen: v5e
topology: v5e:2x2
jax: 0.10.0
libtpu: 0.0.40
codegen_flags: <defaults>
</compile_context>

<pallas_src>
import numpy as np
import jax
import jax.numpy as jnp
from jax.experimental import pallas as pl
from jax.experimental.pallas import tpu as pltpu

# ---- dims consistent with Eq_NLMP defaults ----------------------------------
D_IN = 8                   # irreps_input.dim (== irreps_output.dim -> residual)
D_OUT = 8                  # irreps_output.dim
VAL = 16                   # flattened irreps_val dim
NUM_FES = 16
HX = 4
H_EDGE = HX * D_IN         # 32   edge_val hidden
H_FC = HX * NUM_FES        # 64   fc hidden
H_NODE = HX * D_OUT        # 32   node_upd hidden
FC_IN = 6 + NUM_FES        # 22   [pos_src(3), pos_dst(3), fes(16)]
FC_OUT = VAL * D_OUT       # 128  flattened (val, out) weight per edge
F_EDGE = 3 * D_IN + FC_IN  # 46   fused per-edge feature width
F_PAD = 48                 # padded slab width
H_CAT = H_EDGE + H_FC      # 96   fused hidden width

VMEM_LIMIT = 32 * 1024 * 1024   # fits v5e/v6e (128 MiB) and v7x (64 MiB) with headroom


def _round_up(x, m):
    return ((x + m - 1) // m) * m


# ============================== Kernel A: edges ==============================
def edge_kernel(x_ref, w1_ref, w2_ref, s_ref, hen_ref):
    x = x_ref[...]                                                        # bf16 [TE, 48]
    # fused first layer: cols 0:32 = edge_val hidden, cols 32:96 = fc hidden
    h = jnp.dot(x, w1_ref[...], preferred_element_type=jnp.float32)      # f32 [TE, 96]
    h = jnp.maximum(h, 0.0).astype(jnp.bfloat16)
    # fused second layer: cols 0:128 = v expanded (v[e, c//8]), cols 128:256 = w_flat
    vw = jnp.dot(h, w2_ref[...], preferred_element_type=jnp.float32)     # f32 [TE, 256]
    prod = vw[:, :FC_OUT] * vw[:, FC_OUT:]                               # f32 [TE, 128]
    # per-edge bmm: tp[e, o] = sum_v v[e, v] * w_flat[e, v*D_OUT + o]
    tp = jnp.dot(prod, s_ref[...], preferred_element_type=jnp.float32)   # f32 [TE, 8]
    hen_ref[...] = x[:, :D_IN].astype(jnp.float32) + tp                  # residual (he)


def edge_pass(x, w1, w2, s, *, te):
    e_pad, f = x.shape
    return pl.pallas_call(
        edge_kernel,
        out_shape=jax.ShapeDtypeStruct((e_pad, D_OUT), jnp.float32),
        grid=(e_pad // te,),
        in_specs=[pl.BlockSpec((te, f), lambda i: (i, 0)),
                  pl.BlockSpec(w1.shape, lambda i: (0, 0)),
                  pl.BlockSpec(w2.shape, lambda i: (0, 0)),
                  pl.BlockSpec(s.shape, lambda i: (0, 0))],
        out_specs=pl.BlockSpec((te, D_OUT), lambda i: (i, 0)),
        compiler_params=pltpu.CompilerParams(
            dimension_semantics=("parallel",),
            vmem_limit_bytes=VMEM_LIMIT),
    )(x, w1, w2, s)


# ============================== Kernel B: nodes ==============================
def node_kernel(start_ref, count_ref, hen_ref, nrm_ref, dst_ref, hn_ref,
                wn1a_ref, wn1b_ref, wn2_ref, hnn_ref, acc_ref, iota_ref):
    j = pl.program_id(0)
    k = pl.program_id(1)
    tn = acc_ref.shape[0]

    @pl.when(k == 0)
    def _():
        acc_ref[...] = jnp.zeros_like(acc_ref)
        # hoisted loop-invariant local row ids (same for every k of this node tile)
        iota_ref[...] = jax.lax.broadcasted_iota(jnp.int32, iota_ref.shape, 0)

    # only real edge blocks for this node tile contribute (CSR ranges)
    @pl.when(k < count_ref[j])
    def _():
        # scatter-add: sel[n, e] = norm[e] if dst[e] == j*tn + n else 0  (norm folded in)
        dst_local = dst_ref[...] - j * tn                                 # [1, TE] int32
        sel = jnp.where(iota_ref[...] == dst_local, nrm_ref[...], 0.0)    # [TN, TE] f32
        acc_ref[...] += jnp.dot(sel, hen_ref[...],
                                preferred_element_type=jnp.float32)       # [TN, 8]

    @pl.when(k == pl.num_programs(1) - 1)
    def _():
        hn = hn_ref[...]
        h = jnp.maximum(
            jnp.dot(hn, wn1a_ref[...], preferred_element_type=jnp.float32)
            + jnp.dot(acc_ref[...], wn1b_ref[...], preferred_element_type=jnp.float32),
            0.0)
        hnn_ref[...] = hn + jnp.dot(h, wn2_ref[...],
                                    preferred_element_type=jnp.float32)   # residual


def node_pass(start_blk, count_blk, hen, nrm_row, dst_row, hn_p,
              wn1a, wn1b, wn2, *, tn, te, kmax):
    n_pad = hn_p.shape[0]

    def edge_blk(j, k, start_ref, count_ref):
        # clamp: steps beyond this tile's block count re-use the same block (no DMA)
        return start_ref[j] + jnp.minimum(k, jnp.maximum(count_ref[j] - 1, 0))

    return pl.pallas_call(
        node_kernel,
        out_shape=jax.ShapeDtypeStruct((n_pad, D_OUT), jnp.float32),
        grid_spec=pltpu.PrefetchScalarGridSpec(
            num_scalar_prefetch=2,
            grid=(n_pad // tn, kmax),
            in_specs=[
                pl.BlockSpec((te, D_OUT), lambda j, k, s, c: (edge_blk(j, k, s, c), 0)),
                pl.BlockSpec((1, te),     lambda j, k, s, c: (0, edge_blk(j, k, s, c))),
                pl.BlockSpec((1, te),     lambda j, k, s, c: (0, edge_blk(j, k, s, c))),
                pl.BlockSpec((tn, D_IN),  lambda j, k, s, c: (j, 0)),
                pl.BlockSpec(wn1a.shape,  lambda j, k, s, c: (0, 0)),
                pl.BlockSpec(wn1b.shape,  lambda j, k, s, c: (0, 0)),
                pl.BlockSpec(wn2.shape,   lambda j, k, s, c: (0, 0)),
            ],
            out_specs=pl.BlockSpec((tn, D_OUT), lambda j, k, s, c: (j, 0)),
            scratch_shapes=[pltpu.VMEM((tn, D_OUT), jnp.float32),
                            pltpu.VMEM((tn, te), jnp.int32)],
        ),
        compiler_params=pltpu.CompilerParams(
            dimension_semantics=("parallel", "arbitrary"),
            vmem_limit_bytes=VMEM_LIMIT),
    )(start_blk, count_blk, hen, nrm_row, dst_row, hn_p, wn1a, wn1b, wn2)


# ============================== Weight fusion ================================
def _fused_weights(params):
    c = jnp.arange(FC_OUT)
    # R[v, c] = 1 if c // D_OUT == v ;  S[c, o] = 1 if c % D_OUT == o
    R = (c[None, :] // D_OUT == jnp.arange(VAL)[:, None]).astype(jnp.float32)   # [16,128]
    S = (c[:, None] % D_OUT == jnp.arange(D_OUT)[None, :]).astype(jnp.float32)  # [128, 8]

    w1 = jnp.zeros((F_PAD, H_CAT), jnp.float32)
    w1 = w1.at[0:3 * D_IN, 0:H_EDGE].set(params["wv1"])             # edge_val layer 1
    w1 = w1.at[3 * D_IN:F_EDGE, H_EDGE:H_CAT].set(params["wf1"])    # fc layer 1

    w2 = jnp.zeros((H_CAT, 2 * FC_OUT), jnp.float32)
    w2 = w2.at[0:H_EDGE, 0:FC_OUT].set(params["wv2"] @ R)           # v expansion folded in
    w2 = w2.at[H_EDGE:H_CAT, FC_OUT:2 * FC_OUT].set(params["wf2"])  # fc layer 2
    # bf16 operand streaming (f32 accumulation in-kernel); zero blocks stay exactly zero
    return w1.astype(jnp.bfloat16), w2.astype(jnp.bfloat16), S


# ============================== Full forward =================================
def neq_nlmp_pallas(params, hn, he, pos, fes, norm, edge_index, *,
                    te_max=1024, tn_max=256):
    """Eq_NLMP forward (return_array=True semantics -> (hnn, hen)).

    NOTE: the CSR edge-block tables are built with concrete (host) edge_index, so this
    wrapper runs eagerly; the two pallas_calls themselves are jittable.
    """
    N, E = int(hn.shape[0]), int(he.shape[0])
    src_np = np.asarray(edge_index[0]).astype(np.int64)
    dst_np = np.asarray(edge_index[1]).astype(np.int64)

    # tile sizes; guarantee >=2 blocks per "parallel" axis so both v7x TCs get work
    te = min(max(128, _round_up(te_max, 128)), max(128, _round_up(-(-E // 2), 128)))
    tn = min(max(8, _round_up(tn_max, 8)), max(8, _round_up(-(-N // 2), 8)))
    e_pad = _round_up(E, te)
    n_pad = _round_up(N, tn)
    e_blocks = e_pad // te
    n_tiles = n_pad // tn

    # ---- sort edges by destination (CSR layout for the scatter) -------------
    order = np.argsort(dst_np, kind="stable")
    inv_order = np.empty(E, dtype=np.int64)
    inv_order[order] = np.arange(E)
    dst_s_np = dst_np[order]
    src_s = jnp.asarray(src_np[order], dtype=jnp.int32)
    dst_s = jnp.asarray(dst_s_np, dtype=jnp.int32)
    he_s, fes_s, norm_s = he[order], fes[order], norm[order]

    # ---- fused per-edge slab [E_pad, 48], streamed as bf16 ------------------
    x = jnp.concatenate([he_s, hn[src_s], hn[dst_s], pos[src_s], pos[dst_s], fes_s],
                        axis=1).astype(jnp.bfloat16)                          # [E, 46]
    x = jnp.pad(x, ((0, e_pad - E), (0, F_PAD - x.shape[1])))

    w1, w2, S = _fused_weights(params)
    hen_s = edge_pass(x, w1, w2, S, te=te)                    # [E_pad, 8] f32, sorted order

    # ---- per-node-tile edge-block ranges (scalar-prefetch tables) -----------
    bounds = np.arange(n_tiles + 1, dtype=np.int64) * tn
    cuts = np.searchsorted(dst_s_np, bounds)                  # [n_tiles + 1]
    e_lo, e_hi = cuts[:-1], cuts[1:]
    lo_blk = np.minimum(e_lo // te, e_blocks - 1)
    hi_blk = (e_hi + te - 1) // te
    count_blk = np.where(e_hi > e_lo, hi_blk - lo_blk, 0).astype(np.int32)
    start_blk = lo_blk.astype(np.int32)
    kmax = max(1, int(count_blk.max()))

    # lane-dense per-edge rows; padded edges: norm=0 AND dst=n_pad (never matches a row)
    nrm_row = jnp.zeros((1, e_pad), jnp.float32).at[0, :E].set(norm_s.astype(jnp.float32))
    dst_row = jnp.full((1, e_pad), n_pad, jnp.int32).at[0, :E].set(dst_s)
    hn_p = jnp.pad(hn, ((0, n_pad - N), (0, 0)))

    hnn_p = node_pass(jnp.asarray(start_blk), jnp.asarray(count_blk),
                      hen_s, nrm_row, dst_row, hn_p,
                      params["wn1"][:D_IN], params["wn1"][D_IN:], params["wn2"],
                      tn=tn, te=te, kmax=kmax)

    hen = hen_s[:E][jnp.asarray(inv_order, dtype=jnp.int32)]  # back to original edge order
    return hnn_p[:N], hen


# ============================== Pure-JAX reference ===========================
def neq_nlmp_reference(params, hn, he, pos, fes, norm, edge_index):
    src, dst = edge_index[0], edge_index[1]
    relu = jax.nn.relu
    xe = jnp.concatenate([he, hn[src], hn[dst]], axis=1)
    v = relu(xe @ params["wv1"]) @ params["wv2"]
    xf = jnp.concatenate([pos[src], pos[dst], fes], axis=1)
    wfc = relu(xf @ params["wf1"]) @ params["wf2"]
    W3 = wfc.reshape(-1, VAL, D_OUT)                               # (val, out) row-major
    tp = jnp.einsum("ev,evo->eo", v, W3)                           # bmm(v[:,None,:], W3)
    hen = he + tp
    msg = hen * norm[:, None]
    node_tmp = jnp.zeros((hn.shape[0], D_OUT), jnp.float32).at[dst].add(msg)
    xn = jnp.concatenate([hn, node_tmp], axis=1)
    hnu = relu(xn @ params["wn1"]) @ params["wn2"]
    hnn = hn + hnu
    return hnn, hen


# ============================== Param init ===================================
def init_params(key):
    ks = jax.random.split(key, 6)
    def w(k, fan_in, fan_out):
        return jax.random.normal(k, (fan_in, fan_out), jnp.float32) / jnp.sqrt(float(fan_in))
    return dict(
        wv1=w(ks[0], 3 * D_IN, H_EDGE),
        wv2=w(ks[1], H_EDGE, VAL),
        wf1=w(ks[2], FC_IN, H_FC),
        wf2=w(ks[3], H_FC, FC_OUT),
        wn1=w(ks[4], D_IN + D_OUT, H_NODE),
        wn2=w(ks[5], H_NODE, D_OUT),
    )


def _check(name, got, want, atol=1e-1, rtol=5e-2, mean_tol=2e-2):
    got, want = np.asarray(got), np.asarray(want)
    err = np.abs(got - want)
    # bf16 operand streaming => ~1e-2 RMS error on O(1) values; bound max and mean error
    assert np.all(err <= atol + rtol * np.abs(want)), (name, float(err.max()))
    assert float(err.mean()) < mean_tol, (name, float(err.mean()))


if __name__ == "__main__":
    key = jax.random.PRNGKey(0)
    N, E = 32, 200   # small graph; auto tile selection gives 2 edge tiles / 2 node tiles,
                     # exercising padding, multi-block accumulation and the CSR clamp/skip.
    k_hn, k_he, k_pos, k_fes, k_norm, k_src, k_dst, k_par = jax.random.split(key, 8)

    hn = jax.random.normal(k_hn, (N, D_IN), jnp.float32)
    he = jax.random.normal(k_he, (E, D_IN), jnp.float32)
    pos = jax.random.normal(k_pos, (N, 3), jnp.float32)
    fes = jax.random.normal(k_fes, (E, NUM_FES), jnp.float32)
    norm = jax.random.uniform(k_norm, (E,), jnp.float32, 0.5, 1.5)
    src = jax.random.randint(k_src, (E,), 0, N, jnp.int32)
    dst = jax.random.randint(k_dst, (E,), 0, N, jnp.int32)
    edge_index = jnp.stack([src, dst])

    params = init_params(k_par)

    hnn, hen = neq_nlmp_pallas(params, hn, he, pos, fes, norm, edge_index)
    jax.block_until_ready((hnn, hen))

    hnn_ref, hen_ref = neq_nlmp_reference(params, hn, he, pos, fes, norm, edge_index)
    assert hnn.shape == (N, D_OUT) and hen.shape == (E, D_OUT)
    _check("hen", hen, hen_ref)
    _check("hnn", hnn, hnn_ref)

    print("KERNEL_OK")
</pallas_src>

<mosaic_0001>
module attributes {stable_mosaic.version = 11 : i64} {
  func.func @edge_kernel(%arg0: i32, %arg1: memref<128x48xbf16, #tpu.memory_space<vmem>>, %arg2: memref<48x96xbf16, #tpu.memory_space<vmem>>, %arg3: memref<96x256xbf16, #tpu.memory_space<vmem>>, %arg4: memref<128x8xf32, #tpu.memory_space<vmem>>, %arg5: memref<128x8xf32, #tpu.memory_space<vmem>>) attributes {dimension_semantics = [#tpu.dimension_semantics<parallel>], iteration_bounds = array<i64: 2>, scalar_prefetch = 0 : i64, scratch_operands = 0 : i64, tpu.core_type = #tpu.core_type<tc>, window_params = [{transform_indices = @transform_0, window_bounds = array<i64: 128, 48>}, {pipeline_mode = #tpu.pipeline_mode<synchronous>, transform_indices = @transform_1, window_bounds = array<i64: 48, 96>}, {pipeline_mode = #tpu.pipeline_mode<synchronous>, transform_indices = @transform_2, window_bounds = array<i64: 96, 256>}, {pipeline_mode = #tpu.pipeline_mode<synchronous>, transform_indices = @transform_3, window_bounds = array<i64: 128, 8>}, {transform_indices = @transform_4, window_bounds = array<i64: 128, 8>}]} {
    %c0 = arith.constant 0 : index
    %c0_0 = arith.constant 0 : index
    %0 = vector.load %arg1[%c0, %c0_0] : memref<128x48xbf16, #tpu.memory_space<vmem>>, vector<128x48xbf16>
    %c0_1 = arith.constant 0 : index
    %c0_2 = arith.constant 0 : index
    %1 = vector.load %arg2[%c0_1, %c0_2] : memref<48x96xbf16, #tpu.memory_space<vmem>>, vector<48x96xbf16>
    %cst = arith.constant dense<0.000000e+00> : vector<128x96xf32>
    %2 = tpu.matmul %0, %1, %cst {dimension_numbers = #tpu.dot_dimension_numbers<[1], [0], [0], [1], [0, 0, 1, 1], [], []>} : vector<128x48xbf16>, vector<48x96xbf16>, vector<128x96xf32> -> vector<128x96xf32>
    %cst_3 = arith.constant 0.000000e+00 : f32
    %3 = vector.broadcast %cst_3 : f32 to vector<128x96xf32>
    %4 = arith.maximumf %2, %3 : vector<128x96xf32>
    %5 = arith.truncf %4 : vector<128x96xf32> to vector<128x96xbf16>
    %c0_4 = arith.constant 0 : index
    %c0_5 = arith.constant 0 : index
    %6 = vector.load %arg3[%c0_4, %c0_5] : memref<96x256xbf16, #tpu.memory_space<vmem>>, vector<96x256xbf16>
    %cst_6 = arith.constant dense<0.000000e+00> : vector<128x256xf32>
    %7 = tpu.matmul %5, %6, %cst_6 {dimension_numbers = #tpu.dot_dimension_numbers<[1], [0], [0], [1], [0, 0, 1, 1], [], []>} : vector<128x96xbf16>, vector<96x256xbf16>, vector<128x256xf32> -> vector<128x256xf32>
    %8 = vector.extract_strided_slice %7 {offsets = [0, 0], sizes = [128, 128], strides = [1, 1]} : vector<128x256xf32> to vector<128x128xf32>
    %9 = vector.extract_strided_slice %7 {offsets = [0, 128], sizes = [128, 128], strides = [1, 1]} : vector<128x256xf32> to vector<128x128xf32>
    %10 = arith.mulf %8, %9 : vector<128x128xf32>
    %c0_7 = arith.constant 0 : index
    %c0_8 = arith.constant 0 : index
    %11 = vector.load %arg4[%c0_7, %c0_8] : memref<128x8xf32, #tpu.memory_space<vmem>>, vector<128x8xf32>
    %cst_9 = arith.constant dense<0.000000e+00> : vector<128x8xf32>
    %12 = tpu.matmul %10, %11, %cst_9 {dimension_numbers = #tpu.dot_dimension_numbers<[1], [0], [0], [1], [0, 0, 1, 1], [], []>} : vector<128x128xf32>, vector<128x8xf32>, vector<128x8xf32> -> vector<128x8xf32>
    %13 = vector.extract_strided_slice %0 {offsets = [0, 0], sizes = [128, 8], strides = [1, 1]} : vector<128x48xbf16> to vector<128x8xbf16>
    %14 = arith.extf %13 : vector<128x8xbf16> to vector<128x8xf32>
    %15 = arith.addf %14, %12 : vector<128x8xf32>
    %c0_10 = arith.constant 0 : index
    %c0_11 = arith.constant 0 : index
    %16 = vector.load %arg5[%c0_10, %c0_11] : memref<128x8xf32, #tpu.memory_space<vmem>>, vector<128x8xf32>
    tpu.vector_store %arg5[%c0_10, %c0_11], %15 {strides = array<i32>} : memref<128x8xf32, #tpu.memory_space<vmem>>, vector<128x8xf32>,
    return
  }
  func.func @transform_0(%arg0: i32) -> (i32, i32) {
    %c0_i32 = arith.constant 0 : i32
    %c0_i32_0 = arith.constant 0 : i32
    return %arg0, %c0_i32 : i32, i32
  }
  func.func @transform_1(%arg0: i32) -> (i32, i32) {
    %c0_i32 = arith.constant 0 : i32
    %c0_i32_0 = arith.constant 0 : i32
    %c0_i32_1 = arith.constant 0 : i32
    return %c0_i32, %c0_i32_0 : i32, i32
  }
  func.func @transform_2(%arg0: i32) -> (i32, i32) {
    %c0_i32 = arith.constant 0 : i32
    %c0_i32_0 = arith.constant 0 : i32
    %c0_i32_1 = arith.constant 0 : i32
    return %c0_i32, %c0_i32_0 : i32, i32
  }
  func.func @transform_3(%arg0: i32) -> (i32, i32) {
    %c0_i32 = arith.constant 0 : i32
    %c0_i32_0 = arith.constant 0 : i32
    %c0_i32_1 = arith.constant 0 : i32
    return %c0_i32, %c0_i32_0 : i32, i32
  }
  func.func @transform_4(%arg0: i32) -> (i32, i32) {
    %c0_i32 = arith.constant 0 : i32
    %c0_i32_0 = arith.constant 0 : i32
    return %arg0, %c0_i32 : i32, i32
  }
}

</mosaic_0001>

<bundles_post_ra>
// kernel: tpu_custom_call.1
= control target key start
LH: loop header
LB: loop body
LE: loop exit
PB: predicated region body
PF: predicated region fallthrough
CT: control target
= control target key end

     0   :  { %s984_s15 = smov 0   ;;  %s1210_s0 = inlined_call_operand.vmem [shape: bf16[256,48], index: 0, kind: input, shape index: {}]   ;;  %s1211_s1 = inlined_call_operand.vmem [shape: bf16[48,96], index: 1, kind: input, shape index: {}]   ;;  %s1212_s2 = inlined_call_operand.vmem [shape: bf16[96,256], index: 2, kind: input, shape index: {}]   ;;  %s1213_s3 = inlined_call_operand.vmem [shape: f32[128,8], index: 3, kind: input, shape index: {}]   ;;  %s1214_s4 = inlined_call_operand.vmem [shape: f32[256,8], index: 4, kind: output, shape index: {}]  }
   0x1 LB: > { %s777_s16 = sadd.s32 4294967295, %s957_s15   ;;  %p781_p0 = scmp.ge.s32.totalorder %s957_s15, 1  ;;  %s957_s15 = sphi %s984_s15, %s14_s15  }
   0x2   : > { %p163_p1 = scmp.lt.s32.totalorder %s957_s15, 3 }
   0x4   : > { %p164_p2 = pnand %p781_p0, %p163_p1 }
   0x5   : > { %s782_s19 = sshll.u32 (!%p164_p2), %s777_s16, 4 }
   0x6   : > { %167 = sbr.rel (%p164_p2) target bundleno = 550 (0x226), region = 36  ;;  %p190_p3 = scmp.lt.s32.totalorder (!%p164_p2), %s782_s19, 31 }
   0xb   : > { %v914_v0 = vld [vmem:[%s1211_s1 + $0x10] sm:$0xff]  ;;  %v913_v1 = vld [vmem:[%s1211_s1 + $0x8] sm:$0xff]  ;;  %s1216_s19 = smov (!%p190_p3, %s782_s19), 31  ;;  %v912_v2 = vld [vmem:[%s1211_s1] sm:$0xff]  ;;  %vm282_vm0 = vcmask 392192   ;;  %vm452_vm1 = vcmask 785408  }
   0xc   : > { %312 = vmatpush.bf16.msra.mxu0 %v914_v0  ;;  %s783_s22 = sshll.u32 %s1216_s19, 2  ;;  %v880_v9 = vld [vmem:[%s1212_s2 + $0x50] sm:$0xf]  ;;  %v926_v10 = vld [vmem:[%s1212_s2 + $0x54] sm:$0xf0]  ;;  %s785_s13 = sshll.u32 %s1216_s19, 3 }
   0xd   : > { %s1007_s27 = scalar_lea.vmem %s1210_s0, %s783_s22  ;;  %v925_v11 = vld [vmem:[%s1212_s2 + $0x54] sm:$0xf]  ;;  %v881_v12 = vor.u32 %v926_v10, %v880_v9  ;;  %v882_v13 = vld [vmem:[%s1212_s2 + $0x58] sm:$0xf0]  ;;  %v872_v14 = vld [vmem:[%s1212_s2 + $0x40] sm:$0xf]  ;;  %s1166_s17 = scalar_lea.vmem %s1214_s4, %s785_s13 }
   0xe   : > { %v904_v3 = vld [vmem:[%s1007_s27] sm:$0xff]  ;;  %v905_v4 = vld [vmem:[%s1007_s27 + $0x8] sm:$0xff]  ;;  %v906_v5 = vld [vmem:[%s1007_s27 + $0x10] sm:$0xff]  ;;  %v885_v16 = vor.u32 %v925_v11, %v882_v13  ;;  %vm704_vm2 = vcmask 64512  }
   0xf   : > { %v907_v6 = vld [vmem:[%s1007_s27 + $0x18] sm:$0xff]  ;;  %v908_v7 = vld [vmem:[%s1007_s27 + $0x20] sm:$0xff]  ;;  %v909_v8 = vld [vmem:[%s1007_s27 + $0x28] sm:$0xff]  ;;  %479 = vmatpush.bf16.msra.mxu1 %v881_v12 }
  0x10   : > { %313 = vmatpush.bf16.msra.mxu0 %v913_v1  ;;  %v924_v15 = vld [vmem:[%s1212_s2 + $0x44] sm:$0xf0]  ;;  %v923_v17 = vld [vmem:[%s1212_s2 + $0x44] sm:$0xf]  ;;  %v874_v18 = vld [vmem:[%s1212_s2 + $0x48] sm:$0xf0]  ;;  %528 = vmatpush.bf16.msra.mxu2 %v885_v16 }
  0x11   : > { %v873_v19 = vor.u32 %v924_v15, %v872_v14  ;;  %v877_v20 = vor.u32 %v923_v17, %v874_v18  ;;  %v864_v21 = vld [vmem:[%s1212_s2 + $0x30] sm:$0xf]  ;;  %v922_v22 = vld [vmem:[%s1212_s2 + $0x34] sm:$0xf0]  ;;  %v921_v23 = vld [vmem:[%s1212_s2 + $0x34] sm:$0xf] }
  0x12   : > { %v866_v24 = vld [vmem:[%s1212_s2 + $0x38] sm:$0xf0]  ;;  %v865_v25 = vor.u32 %v922_v22, %v864_v21  ;;  %v910_v27 = vld [vmem:[%s1007_s27 + $0x30] sm:$0xff]  ;;  %v856_v28 = vld [vmem:[%s1212_s2 + $0x20] sm:$0xf] }
  0x13   : > { %480 = vmatpush.bf16.msra.mxu1 %v873_v19  ;;  %v869_v26 = vor.u32 %v921_v23, %v866_v24  ;;  %v920_v29 = vld [vmem:[%s1212_s2 + $0x24] sm:$0xf0]  ;;  %v919_v30 = vld [vmem:[%s1212_s2 + $0x24] sm:$0xf]  ;;  %v858_v32 = vld [vmem:[%s1212_s2 + $0x28] sm:$0xf0] }
  0x14   : > { %314 = vmatpush.bf16.msra.mxu0 %v912_v2  ;;  %529 = vmatpush.bf16.msra.mxu2 %v877_v20  ;;  %v857_v31 = vor.u32 %v920_v29, %v856_v28  ;;  %v861_v33 = vor.u32 %v919_v30, %v858_v32  ;;  %v848_v34 = vld [vmem:[%s1212_s2 + $0x10] sm:$0xf]  ;;  %v918_v35 = vld [vmem:[%s1212_s2 + $0x14] sm:$0xf0]  ;;  %v917_v36 = vld [vmem:[%s1212_s2 + $0x14] sm:$0xf] }
  0x15   : > { %v849_v37 = vor.u32 %v918_v35, %v848_v34  ;;  %v850_v38 = vld [vmem:[%s1212_s2 + $0x18] sm:$0xf0]  ;;  %v840_v40 = vld [vmem:[%s1212_s2] sm:$0xf]  ;;  %v916_v41 = vld [vmem:[%s1212_s2 + $0x4] sm:$0xf0] }
  0x16   : > { %v853_v39 = vor.u32 %v917_v36, %v850_v38  ;;  %v915_v42 = vld [vmem:[%s1212_s2 + $0x4] sm:$0xf]  ;;  %v841_v43 = vor.u32 %v916_v41, %v840_v40  ;;  %v842_v44 = vld [vmem:[%s1212_s2 + $0x8] sm:$0xf0]  ;;  %v911_v46 = vld [vmem:[%s1007_s27 + $0x38] sm:$0xff] }
  0x17   : > { %830 = vmatmul.msk.bf16.vlgmr.msra.gmra.mxu0 %vm282_vm0, %v904_v3  ;;  %481 = vmatpush.bf16.msra.mxu1 %v865_v25  ;;  %v845_v45 = vor.u32 %v915_v42, %v842_v44  ;;  %v606_v9 = vld [vmem:[%s1213_s3 + $0x78] sm:$0xff]  ;;  %v605_v10 = vld [vmem:[%s1213_s3 + $0x70] sm:$0xff]  ;;  %v604_v11 = vld [vmem:[%s1213_s3 + $0x68] sm:$0xff] }
  0x18   : > { %530 = vmatpush.bf16.msra.mxu2 %v869_v26  ;;  %607 = vmatpush.msrb.mxu0 %v606_v9  ;;  %v603_v15 = vld [vmem:[%s1213_s3 + $0x60] sm:$0xff]  ;;  %v602_v17 = vld [vmem:[%s1213_s3 + $0x58] sm:$0xff]  ;;  %v601_v18 = vld [vmem:[%s1213_s3 + $0x50] sm:$0xff] }
  0x19   : > { %927 = vmatpush.msra.mxu3 %v606_v9  ;;  %v600_v19 = vld [vmem:[%s1213_s3 + $0x48] sm:$0xff]  ;;  %v599_v20 = vld [vmem:[%s1213_s3 + $0x40] sm:$0xff]  ;;  %v598_v22 = vld [vmem:[%s1213_s3 + $0x38] sm:$0xff] }
  0x1a   : > { %608 = vmatpush.msrb.mxu0 %v605_v10  ;;  %v597_v23 = vld [vmem:[%s1213_s3 + $0x30] sm:$0xff]  ;;  %v596_v24 = vld [vmem:[%s1213_s3 + $0x28] sm:$0xff]  ;;  %v595_v28 = vld [vmem:[%s1213_s3 + $0x20] sm:$0xff] }
  0x1b   : > { %482 = vmatpush.bf16.msra.mxu1 %v857_v31  ;;  %928 = vmatpush.msra.mxu3 %v605_v10  ;;  %v594_v29 = vld [vmem:[%s1213_s3 + $0x18] sm:$0xff]  ;;  %v593_v31 = vld [vmem:[%s1213_s3 + $0x10] sm:$0xff]  ;;  %v592_v32 = vld [vmem:[%s1213_s3 + $0x8] sm:$0xff] }
  0x1c   : > { %531 = vmatpush.bf16.msra.mxu2 %v861_v33  ;;  %609 = vmatpush.msrb.mxu0 %v604_v11  ;;  %v591_v34 = vld [vmem:[%s1213_s3] sm:$0xff] }
  0x1d   : > { %929 = vmatpush.msra.mxu3 %v604_v11 }
  0x1e   : > { %610 = vmatpush.msrb.mxu0 %v603_v15 }
  0x1f   : > { %483 = vmatpush.bf16.msra.mxu1 %v849_v37  ;;  %930 = vmatpush.msra.mxu3 %v603_v15 }
  0x20   : > { %532 = vmatpush.bf16.msra.mxu2 %v853_v39  ;;  %611 = vmatpush.msrb.mxu0 %v602_v17 }
  0x21   : > { %931 = vmatpush.msra.mxu3 %v602_v17 }
  0x22   : > { %612 = vmatpush.msrb.mxu0 %v601_v18 }
  0x23   : > { %484 = vmatpush.bf16.msra.mxu1 %v841_v43  ;;  %932 = vmatpush.msra.mxu3 %v601_v18 }
  0x24   : > { %533 = vmatpush.bf16.msra.mxu2 %v845_v45  ;;  %613 = vmatpush.msrb.mxu0 %v600_v19 }
  0x25   : > { %933 = vmatpush.msra.mxu3 %v600_v19 }
  0x26   : > { %614 = vmatpush.msrb.mxu0 %v599_v20 }
  0x27   : > { %831 = vmatmul.msk.bf16.gmra.mxu0 %vm282_vm0, %v905_v4  ;;  %934 = vmatpush.msra.mxu3 %v599_v20 }
  0x28   : > { %615 = vmatpush.msrb.mxu0 %v598_v22 }
  0x29   : > { %935 = vmatpush.msra.mxu3 %v598_v22 }
  0x2a   : > { %616 = vmatpush.msrb.mxu0 %v597_v23 }
  0x2b   : > { %936 = vmatpush.msra.mxu3 %v597_v23  ;;  %v202_v23 = vld [vmem:[%s1007_s27] sm:$0xff]  }
  0x2c   : > { %617 = vmatpush.msrb.mxu0 %v596_v24 }
  0x2d   : > { %937 = vmatpush.msra.mxu3 %v596_v24  ;;  %v672_v24 = vunpack.c.l.bf16 %v202_v23 }
  0x2e   : > { %618 = vmatpush.msrb.mxu0 %v595_v28 }
  0x2f   : > { %938 = vmatpush.msra.mxu3 %v595_v28 }
  0x30   : > { %619 = vmatpush.msrb.mxu0 %v594_v29 }
  0x31   : > { %939 = vmatpush.msra.mxu3 %v594_v29 }
  0x32   : > { %620 = vmatpush.msrb.mxu0 %v593_v31 }
  0x33   : > { %940 = vmatpush.msra.mxu3 %v593_v31 }
  0x34   : > { %621 = vmatpush.msrb.mxu0 %v592_v32 }
  0x35   : > { %941 = vmatpush.msra.mxu3 %v592_v32 }
  0x36   : > { %622 = vmatpush.msrb.mxu0 %v591_v34 }
  0x37   : > { %832 = vmatmul.msk.bf16.gmra.mxu0 %vm282_vm0, %v906_v5  ;;  %942 = vmatpush.msra.mxu3 %v591_v34 }
  0x47   : > { %833 = vmatmul.msk.bf16.gmra.mxu0 %vm282_vm0, %v907_v6 }
  0x57   : > { %834 = vmatmul.msk.bf16.gmra.mxu0 %vm282_vm0, %v908_v7 }
  0x67   : > { %835 = vmatmul.msk.bf16.gmra.mxu0 %vm282_vm0, %v909_v8 }
  0x77   : > { %836 = vmatmul.msk.bf16.gmra.mxu0 %vm282_vm0, %v910_v27 }
  0x87   : > { %837 = vmatmul.msk.bf16.gmra.mxu0 %vm282_vm0, %v911_v46 }
  0x94   : > { %v316_v47 = vpop.f32.mrf.mxu0 }
  0x95   : > { %v356_v49 = vmax.f32 %v316_v47, 0.0 }
  0x9c   : > { %v318_v48 = vpop.f32.mrf.mxu0 }
  0x9d   : > { %v357_v50 = vmax.f32 %v318_v48, 0.0 }
  0x9f   : > { %v372_v51 = vpack.c.bf16 %v357_v50, %v356_v49 }
  0xa1   : > { %886 = vmatmul.msk.bf16.vlgmr.msra.gmra.mxu1 %vm452_vm1, %v372_v51  ;;  %894 = vmatmul.msk.bf16.vlgmr.msra.gmra.mxu2 %vm452_vm1, %v372_v51 }
  0xa4   : > { %v321_v52 = vpop.f32.mrf.mxu0 }
  0xa5   : > { %v358_v54 = vmax.f32 %v321_v52, 0.0 }
  0xac   : > { %v323_v53 = vpop.f32.mrf.mxu0 }
  0xad   : > { %v359_v55 = vmax.f32 %v323_v53, 0.0 }
  0xaf   : > { %v373_v56 = vpack.c.bf16 %v359_v55, %v358_v54 }
  0xb1   : > { %887 = vmatmul.msk.bf16.gmra.mxu1 %vm452_vm1, %v373_v56  ;;  %895 = vmatmul.msk.bf16.gmra.mxu2 %vm452_vm1, %v373_v56 }
  0xb4   : > { %v326_v57 = vpop.f32.mrf.mxu0 }
  0xb5   : > { %v360_v59 = vmax.f32 %v326_v57, 0.0 }
  0xbc   : > { %v328_v58 = vpop.f32.mrf.mxu0 }
  0xbd   : > { %v361_v60 = vmax.f32 %v328_v58, 0.0 }
  0xbf   : > { %v374_v61 = vpack.c.bf16 %v361_v60, %v360_v59 }
  0xc1   : > { %888 = vmatmul.msk.bf16.gmra.mxu1 %vm452_vm1, %v374_v61  ;;  %896 = vmatmul.msk.bf16.gmra.mxu2 %vm452_vm1, %v374_v61 }
  0xc4   : > { %v331_v62 = vpop.f32.mrf.mxu0 }
  0xc5   : > { %v362_v0 = vmax.f32 %v331_v62, 0.0 }
  0xcc   : > { %v333_v63 = vpop.f32.mrf.mxu0 }
  0xcd   : > { %v363_v1 = vmax.f32 %v333_v63, 0.0 }
  0xcf   : > { %v375_v2 = vpack.c.bf16 %v363_v1, %v362_v0 }
  0xd1   : > { %889 = vmatmul.msk.bf16.gmra.mxu1 %vm452_vm1, %v375_v2  ;;  %897 = vmatmul.msk.bf16.gmra.mxu2 %vm452_vm1, %v375_v2 }
  0xd4   : > { %v336_v3 = vpop.f32.mrf.mxu0 }
  0xd5   : > { %v364_v5 = vmax.f32 %v336_v3, 0.0 }
  0xdc   : > { %v338_v4 = vpop.f32.mrf.mxu0 }
  0xdd   : > { %v365_v6 = vmax.f32 %v338_v4, 0.0 }
  0xdf   : > { %v376_v7 = vpack.c.bf16 %v365_v6, %v364_v5 }
  0xe1   : > { %890 = vmatmul.msk.bf16.gmra.mxu1 %vm452_vm1, %v376_v7  ;;  %898 = vmatmul.msk.bf16.gmra.mxu2 %vm452_vm1, %v376_v7 }
  0xe4   : > { %v341_v8 = vpop.f32.mrf.mxu0 }
  0xe5   : > { %v366_v13 = vmax.f32 %v341_v8, 0.0 }
  0xec   : > { %v343_v12 = vpop.f32.mrf.mxu0 }
  0xed   : > { %v367_v14 = vmax.f32 %v343_v12, 0.0 }
  0xef   : > { %v377_v16 = vpack.c.bf16 %v367_v14, %v366_v13 }
  0xf1   : > { %891 = vmatmul.msk.bf16.gmra.mxu1 %vm452_vm1, %v377_v16  ;;  %899 = vmatmul.msk.bf16.gmra.mxu2 %vm452_vm1, %v377_v16 }
  0xf4   : > { %v346_v21 = vpop.f32.mrf.mxu0 }
  0xf5   : > { %v368_v26 = vmax.f32 %v346_v21, 0.0 }
  0xfc   : > { %v348_v25 = vpop.f32.mrf.mxu0 }
  0xfd   : > { %v369_v27 = vmax.f32 %v348_v25, 0.0 }
  0xff   : > { %v378_v30 = vpack.c.bf16 %v369_v27, %v368_v26  ;;  %v673_v27 = vunpack.c.h.bf16 %v202_v23 }
 0x101   : > { %892 = vmatmul.msk.bf16.gmra.mxu1 %vm452_vm1, %v378_v30  ;;  %900 = vmatmul.msk.bf16.gmra.mxu2 %vm452_vm1, %v378_v30  ;;  %v204_v30 = vld [vmem:[%s1007_s27 + $0x8] sm:$0xff]  }
 0x102   : > { %v674_v31 = vunpack.c.l.bf16 %v204_v30  ;;  %v675_v34 = vunpack.c.h.bf16 %v204_v30 }
 0x104   : > { %v351_v33 = vpop.f32.mrf.mxu0 }
 0x105   : > { %v370_v36 = vmax.f32 %v351_v33, 0.0 }
 0x10c   : > { %v353_v35 = vpop.f32.mrf.mxu0 }
 0x10d   : > { %v371_v37 = vmax.f32 %v353_v35, 0.0 }
 0x10f   : > { %v379_v38 = vpack.c.bf16 %v371_v37, %v370_v36  ;;  %v206_v37 = vld [vmem:[%s1007_s27 + $0x10] sm:$0xff]  }
 0x111   : > { %893 = vmatmul.msk.bf16.gmra.mxu1 %vm452_vm1, %v379_v38  ;;  %901 = vmatmul.msk.bf16.gmra.mxu2 %vm452_vm1, %v379_v38  ;;  %v676_v38 = vunpack.c.l.bf16 %v206_v37 }
 0x11e   : > { %v486_v39 = vpop.f32.mrf.mxu1 }
 0x124   : > { %v535_v40 = vpop.f32.mrf.mxu2 }
 0x125   : > { %v575_v41 = vmul.f32 %v535_v40, %v486_v39 }
 0x126   : > { %v488_v42 = vpop.f32.mrf.mxu1 }
 0x127   : > { %623 = vmatmul.f32.vlgmr.msrb.gmra.mxu0 %v575_v41  ;;  %v677_v41 = vunpack.c.h.bf16 %v206_v37 }
 0x12c   : > { %v537_v43 = vpop.f32.mrf.mxu2 }
 0x12d   : > { %v576_v44 = vmul.f32 %v537_v43, %v488_v42 }
 0x12e   : > { %v491_v45 = vpop.f32.mrf.mxu1 }
 0x12f   : > { %626 = vmatmul.f32.vlgmr.msra.gmra.mxu3 %v576_v44  ;;  %v208_v44 = vld [vmem:[%s1007_s27 + $0x18] sm:$0xff]  }
 0x134   : > { %v540_v46 = vpop.f32.mrf.mxu2 }
 0x135   : > { %v577_v47 = vmul.f32 %v540_v46, %v491_v45  ;;  %v678_v45 = vunpack.c.l.bf16 %v208_v44 }
 0x136   : > { %v493_v48 = vpop.f32.mrf.mxu1 }
 0x137   : > { %629 = vmatmul.f32.gmra.mxu3 %v577_v47 }
 0x13c   : > { %v542_v49 = vpop.f32.mrf.mxu2 }
 0x13d   : > { %v578_v50 = vmul.f32 %v542_v49, %v493_v48  ;;  %v679_v48 = vunpack.c.h.bf16 %v208_v44 }
 0x13e   : > { %v496_v51 = vpop.f32.mrf.mxu1 }
 0x13f   : > { %632 = vmatmul.f32.gmra.mxu3 %v578_v50 }
 0x144   : > { %v545_v52 = vpop.f32.mrf.mxu2 }
 0x145   : > { %v579_v53 = vmul.f32 %v545_v52, %v496_v51  ;;  %v210_v51 = vld [vmem:[%s1007_s27 + $0x20] sm:$0xff]  }
 0x146   : > { %v498_v54 = vpop.f32.mrf.mxu1  ;;  %v680_v52 = vunpack.c.l.bf16 %v210_v51 }
 0x147   : > { %635 = vmatmul.f32.gmra.mxu3 %v579_v53 }
 0x14c   : > { %v547_v55 = vpop.f32.mrf.mxu2 }
 0x14d   : > { %v580_v56 = vmul.f32 %v547_v55, %v498_v54  ;;  %v681_v55 = vunpack.c.h.bf16 %v210_v51 }
 0x14e   : > { %v501_v57 = vpop.f32.mrf.mxu1 }
 0x14f   : > { %638 = vmatmul.f32.gmra.mxu3 %v580_v56 }
 0x154   : > { %v550_v58 = vpop.f32.mrf.mxu2 }
 0x155   : > { %v581_v59 = vmul.f32 %v550_v58, %v501_v57  ;;  %v212_v58 = vld [vmem:[%s1007_s27 + $0x28] sm:$0xff]  }
 0x156   : > { %v503_v60 = vpop.f32.mrf.mxu1 }
 0x157   : > { %641 = vmatmul.f32.gmra.mxu3 %v581_v59  ;;  %v682_v59 = vunpack.c.l.bf16 %v212_v58 }
 0x15c   : > { %v552_v61 = vpop.f32.mrf.mxu2 }
 0x15d   : > { %v582_v62 = vmul.f32 %v552_v61, %v503_v60 }
 0x15e   : > { %v506_v63 = vpop.f32.mrf.mxu1 }
 0x15f   : > { %644 = vmatmul.f32.gmra.mxu3 %v582_v62  ;;  %v683_v62 = vunpack.c.h.bf16 %v212_v58 }
 0x164   : > { %v555_v0 = vpop.f32.mrf.mxu2 }
 0x165   : > { %v583_v1 = vmul.f32 %v555_v0, %v506_v63 }
 0x166   : > { %v508_v2 = vpop.f32.mrf.mxu1 }
 0x167   : > { %647 = vmatmul.f32.gmra.mxu3 %v583_v1  ;;  %v214_v1 = vld [vmem:[%s1007_s27 + $0x30] sm:$0xff]  }
 0x16c   : > { %v557_v3 = vpop.f32.mrf.mxu2 }
 0x16d   : > { %v584_v4 = vmul.f32 %v557_v3, %v508_v2  ;;  %v684_v2 = vunpack.c.l.bf16 %v214_v1 }
 0x16e   : > { %v511_v5 = vpop.f32.mrf.mxu1 }
 0x16f   : > { %650 = vmatmul.f32.gmra.mxu3 %v584_v4 }
 0x174   : > { %v560_v6 = vpop.f32.mrf.mxu2 }
 0x175   : > { %v585_v7 = vmul.f32 %v560_v6, %v511_v5  ;;  %v685_v5 = vunpack.c.h.bf16 %v214_v1 }
 0x176   : > { %v513_v8 = vpop.f32.mrf.mxu1 }
 0x177   : > { %653 = vmatmul.f32.gmra.mxu3 %v585_v7 }
 0x17c   : > { %v562_v9 = vpop.f32.mrf.mxu2 }
 0x17d   : > { %v586_v10 = vmul.f32 %v562_v9, %v513_v8  ;;  %v216_v8 = vld [vmem:[%s1007_s27 + $0x38] sm:$0xff]  }
 0x17e   : > { %v516_v11 = vpop.f32.mrf.mxu1  ;;  %v686_v9 = vunpack.c.l.bf16 %v216_v8 }
 0x17f   : > { %656 = vmatmul.f32.gmra.mxu3 %v586_v10 }
 0x184   : > { %v565_v12 = vpop.f32.mrf.mxu2 }
 0x185   : > { %v587_v13 = vmul.f32 %v565_v12, %v516_v11  ;;  %v687_v12 = vunpack.c.h.bf16 %v216_v8 }
 0x186   : > { %v518_v14 = vpop.f32.mrf.mxu1 }
 0x187   : > { %659 = vmatmul.f32.gmra.mxu3 %v587_v13 }
 0x18c   : > { %v567_v15 = vpop.f32.mrf.mxu2 }
 0x18d   : > { %v588_v16 = vmul.f32 %v567_v15, %v518_v14 }
 0x18e   : > { %v521_v17 = vpop.f32.mrf.mxu1 }
 0x18f   : > { %662 = vmatmul.f32.gmra.mxu3 %v588_v16 }
 0x194   : > { %v570_v18 = vpop.f32.mrf.mxu2 }
 0x195   : > { %v589_v19 = vmul.f32 %v570_v18, %v521_v17 }
 0x196   : > { %v523_v20 = vpop.f32.mrf.mxu1 }
 0x197   : > { %665 = vmatmul.f32.gmra.mxu3 %v589_v19 }
 0x19c   : > { %v572_v21 = vpop.f32.mrf.mxu2 }
 0x19d   : > { %v590_v22 = vmul.f32 %v572_v21, %v523_v20 }
 0x19f   : > { %668 = vmatmul.f32.gmra.mxu3 %v590_v22 }
 0x1a4   : > { %v624_v25 = vpop.f32.mrf.mxu0 }
 0x1a5   : > { %v688_v26 = vadd.f32 %v672_v24, %v624_v25 }
 0x1a7   : > { %705 = vst.msk [vmem:[%s1166_s17] sm:$0xff] %vm704_vm2, %v688_v26 }
 0x1b2   : > { %v627_v28 = vpop.f32.mrf.mxu3 }
 0x1b3   : > { %v689_v29 = vadd.f32 %v673_v27, %v627_v28 }
 0x1b5   : > { %706 = vst.msk [vmem:[%s1166_s17 + $0x8] sm:$0xff] %vm704_vm2, %v689_v29 }
 0x1ba   : > { %v630_v32 = vpop.f32.mrf.mxu3 }
 0x1bb   : > { %v690_v33 = vadd.f32 %v674_v31, %v630_v32 }
 0x1bd   : > { %707 = vst.msk [vmem:[%s1166_s17 + $0x10] sm:$0xff] %vm704_vm2, %v690_v33 }
 0x1c2   : > { %v633_v35 = vpop.f32.mrf.mxu3 }
 0x1c3   : > { %v691_v36 = vadd.f32 %v675_v34, %v633_v35 }
 0x1c5   : > { %708 = vst.msk [vmem:[%s1166_s17 + $0x18] sm:$0xff] %vm704_vm2, %v691_v36 }
 0x1ca   : > { %v636_v39 = vpop.f32.mrf.mxu3 }
 0x1cb   : > { %v692_v40 = vadd.f32 %v676_v38, %v636_v39 }
 0x1cd   : > { %709 = vst.msk [vmem:[%s1166_s17 + $0x20] sm:$0xff] %vm704_vm2, %v692_v40 }
 0x1d2   : > { %v639_v42 = vpop.f32.mrf.mxu3 }
 0x1d3   : > { %v693_v43 = vadd.f32 %v677_v41, %v639_v42 }
 0x1d5   : > { %710 = vst.msk [vmem:[%s1166_s17 + $0x28] sm:$0xff] %vm704_vm2, %v693_v43 }
 0x1da   : > { %v642_v46 = vpop.f32.mrf.mxu3 }
 0x1db   : > { %v694_v47 = vadd.f32 %v678_v45, %v642_v46 }
 0x1dd   : > { %711 = vst.msk [vmem:[%s1166_s17 + $0x30] sm:$0xff] %vm704_vm2, %v694_v47 }
 0x1e2   : > { %v645_v49 = vpop.f32.mrf.mxu3 }
 0x1e3   : > { %v695_v50 = vadd.f32 %v679_v48, %v645_v49 }
 0x1e5   : > { %712 = vst.msk [vmem:[%s1166_s17 + $0x38] sm:$0xff] %vm704_vm2, %v695_v50 }
 0x1ea   : > { %v648_v53 = vpop.f32.mrf.mxu3 }
 0x1eb   : > { %v696_v54 = vadd.f32 %v680_v52, %v648_v53 }
 0x1ed   : > { %713 = vst.msk [vmem:[%s1166_s17 + $0x40] sm:$0xff] %vm704_vm2, %v696_v54 }
 0x1f2   : > { %v651_v56 = vpop.f32.mrf.mxu3 }
 0x1f3   : > { %v697_v57 = vadd.f32 %v681_v55, %v651_v56 }
 0x1f5   : > { %714 = vst.msk [vmem:[%s1166_s17 + $0x48] sm:$0xff] %vm704_vm2, %v697_v57 }
 0x1fa   : > { %v654_v60 = vpop.f32.mrf.mxu3 }
 0x1fb   : > { %v698_v61 = vadd.f32 %v682_v59, %v654_v60 }
 0x1fd   : > { %715 = vst.msk [vmem:[%s1166_s17 + $0x50] sm:$0xff] %vm704_vm2, %v698_v61 }
 0x202   : > { %v657_v63 = vpop.f32.mrf.mxu3 }
 0x203   : > { %v699_v0 = vadd.f32 %v683_v62, %v657_v63 }
 0x205   : > { %716 = vst.msk [vmem:[%s1166_s17 + $0x58] sm:$0xff] %vm704_vm2, %v699_v0 }
 0x20a   : > { %v660_v3 = vpop.f32.mrf.mxu3 }
 0x20b   : > { %v700_v4 = vadd.f32 %v684_v2, %v660_v3 }
 0x20d   : > { %717 = vst.msk [vmem:[%s1166_s17 + $0x60] sm:$0xff] %vm704_vm2, %v700_v4 }
 0x212   : > { %v663_v6 = vpop.f32.mrf.mxu3 }
 0x213   : > { %v701_v7 = vadd.f32 %v685_v5, %v663_v6 }
 0x215   : > { %718 = vst.msk [vmem:[%s1166_s17 + $0x68] sm:$0xff] %vm704_vm2, %v701_v7 }
 0x21a   : > { %v666_v10 = vpop.f32.mrf.mxu3 }
 0x21b   : > { %v702_v11 = vadd.f32 %v686_v9, %v666_v10 }
 0x21d   : > { %719 = vst.msk [vmem:[%s1166_s17 + $0x70] sm:$0xff] %vm704_vm2, %v702_v11 }
 0x222   : > { %v669_v13 = vpop.f32.mrf.mxu3 }
 0x223   : > { %v703_v14 = vadd.f32 %v687_v12, %v669_v13 }
 0x225   : > { %720 = vst.msk [vmem:[%s1166_s17 + $0x78] sm:$0xff] %vm704_vm2, %v703_v14 }
 0x226 PF: > { %s14_s15 = sadd.s32 1, %s957_s15  }
 0x227   : > { %p11_p4 = scmp.ge.s32.totalorder %s14_s15, 4  }
 0x229   :  { %13 = sbr.rel (!%p11_p4) target bundleno = 1 (0x1), region = 66 }

</bundles_post_ra>
